<compile_context>
chip_gen: v7x
topology: tpu7x:2x2x1
jax: 0.10.0
libtpu: 0.0.40
codegen_flags: <defaults>
</compile_context>

<pallas_src>
import functools

import jax
import jax.numpy as jnp
from jax.experimental import pallas as pl
from jax.experimental.pallas import tpu as pltpu


def _down_gemm_kernel(w_ref, b_ref, p_ref, o_ref):
    # w_ref: (C_out, K)   b_ref: (C_out, 1)
    # p_ref: (K, tile_m)  o_ref: (C_out, tile_m)   (leading batch dim squeezed)
    acc = jnp.dot(w_ref[...], p_ref[...], preferred_element_type=jnp.float32)
    o_ref[...] = (acc + b_ref[...]).astype(o_ref.dtype)


def down_forward(x, weight, bias, scale_factor, *, tile_m=2048, compute_dtype=None):
    """Pallas implementation of Down.forward.

    x:      (B, C, T, W, H)
    weight: (C_out, C, sf, sf, sf)  (PyTorch Conv3d layout)
    bias:   (C_out,)
    returns (B, C_out, T//sf, W//sf, H//sf)
    """
    sf = int(scale_factor)
    B, C, T, W, H = x.shape
    C_out = weight.shape[0]
    assert weight.shape == (C_out, C, sf, sf, sf)
    assert T % sf == 0 and W % sf == 0 and H % sf == 0
    To, Wo, Ho = T // sf, W // sf, H // sf
    K = C * sf * sf * sf
    Mb = To * Wo * Ho

    # ---- space-to-depth: (B,C,T,W,H) -> (B, K, Mb)  (K on sublanes, M on lanes)
    xp = x.reshape(B, C, To, sf, Wo, sf, Ho, sf)
    # axes -> (b, ci, kt, kw, kh, to, wo, ho): single XLA transpose of the input
    xp = jnp.transpose(xp, (0, 1, 3, 5, 7, 2, 4, 6))
    patches = xp.reshape(B, K, Mb)

    w2d = weight.reshape(C_out, K)            # columns in (ci, kt, kw, kh) order
    b2d = bias.reshape(C_out, 1).astype(jnp.float32)

    if compute_dtype is not None:
        patches = patches.astype(compute_dtype)
        w2d = w2d.astype(compute_dtype)

    # ---- tile selection (no padding; boundary blocks handled by Pallas) ----
    if Mb <= tile_m:
        tm = Mb                                # full dim -> always legal
    else:
        tm = max(128, (tile_m // 128) * 128)   # lane-aligned tile
    n_m = pl.cdiv(Mb, tm)
    # v7x has 2 TensorCores: make sure the parallel grid has >= 2 tiles.
    if B * n_m < 2 and Mb % 256 == 0:
        tm = Mb // 2
        n_m = 2

    in_bytes = int(jnp.dtype(patches.dtype).itemsize)
    out_bytes = int(jnp.dtype(x.dtype).itemsize)
    cost = pl.CostEstimate(
        flops=2 * B * Mb * K * C_out,
        transcendentals=0,
        bytes_accessed=(B * K * Mb * in_bytes
                        + C_out * K * in_bytes
                        + B * C_out * Mb * out_bytes),
    )

    out3d = pl.pallas_call(
        _down_gemm_kernel,
        out_shape=jax.ShapeDtypeStruct((B, C_out, Mb), x.dtype),
        grid_spec=pltpu.PrefetchScalarGridSpec(
            num_scalar_prefetch=0,
            grid=(B, n_m),
            in_specs=[
                pl.BlockSpec((C_out, K), lambda b, i: (0, 0)),       # resident weight
                pl.BlockSpec((C_out, 1), lambda b, i: (0, 0)),       # resident bias
                pl.BlockSpec((None, K, tm), lambda b, i: (b, 0, i)), # patch tile
            ],
            out_specs=pl.BlockSpec((None, C_out, tm), lambda b, i: (b, 0, i)),
        ),
        compiler_params=pltpu.CompilerParams(
            dimension_semantics=("parallel", "parallel")),
        cost_estimate=cost,
    )(w2d, b2d, patches)

    # (B, C_out, Mb) -> (B, C_out, To, Wo, Ho): pure reshape, no data movement.
    return out3d.reshape(B, C_out, To, Wo, Ho)


def _reference_down(x, weight, bias, sf):
    # Pure-JAX reference (strided conv via lax.conv_general_dilated).
    return jax.lax.conv_general_dilated(
        x, weight,
        window_strides=(sf, sf, sf),
        padding="VALID",
        dimension_numbers=("NCDHW", "OIDHW", "NCDHW"),
    ) + bias.reshape(1, -1, 1, 1, 1)


if __name__ == "__main__":
    # Down(in_ch=4, out_ch=4, scale_factor=2, padding_mode='zeros')
    B, C, T, W, H = 2, 4, 8, 16, 16
    sf = 2

    key = jax.random.PRNGKey(0)
    kx, kw, kb = jax.random.split(key, 3)

    x = jax.random.normal(kx, (B, C, T, W, H), dtype=jnp.float32)
    # deterministic init mimicking PyTorch's uniform(-1/sqrt(fan_in), +1/sqrt(fan_in))
    fan_in = C * sf * sf * sf
    bound = 1.0 / (fan_in ** 0.5)
    weight = jax.random.uniform(kw, (C, C, sf, sf, sf), jnp.float32,
                                minval=-bound, maxval=bound)
    bias = jax.random.uniform(kb, (C,), jnp.float32, minval=-bound, maxval=bound)

    fwd = jax.jit(functools.partial(down_forward, scale_factor=sf))
    out = jax.block_until_ready(fwd(x, weight, bias))

    ref = _reference_down(x, weight, bias, sf)
    assert out.shape == (B, C, T // sf, W // sf, H // sf), out.shape
    assert jnp.allclose(out, ref, atol=1e-5, rtol=1e-5), "mismatch vs reference"

    print("KERNEL_OK")
</pallas_src>

<mosaic_0001>
module attributes {stable_mosaic.version = 11 : i64} {
  func.func @_down_gemm_kernel(%arg0: i32, %arg1: i32, %arg2: memref<4x32xf32, #tpu.memory_space<vmem>>, %arg3: memref<4x1xf32, #tpu.memory_space<vmem>>, %arg4: memref<1x32x256xf32, #tpu.memory_space<vmem>>, %arg5: memref<1x4x256xf32, #tpu.memory_space<vmem>>) attributes {dimension_semantics = [#tpu.dimension_semantics<parallel>, #tpu.dimension_semantics<parallel>], iteration_bounds = array<i64: 2, 1>, scalar_prefetch = 0 : i64, scratch_operands = 0 : i64, tpu.core_type = #tpu.core_type<tc>, window_params = [{pipeline_mode = #tpu.pipeline_mode<synchronous>, transform_indices = @transform_0, window_bounds = array<i64: 4, 32>}, {pipeline_mode = #tpu.pipeline_mode<synchronous>, transform_indices = @transform_1, window_bounds = array<i64: 4, 1>}, {transform_indices = @transform_2, window_bounds = array<i64: 1, 32, 256>}, {transform_indices = @transform_3, window_bounds = array<i64: 1, 4, 256>}]} {
    %c0 = arith.constant 0 : index
    %c0_0 = arith.constant 0 : index
    %0 = vector.load %arg2[%c0, %c0_0] : memref<4x32xf32, #tpu.memory_space<vmem>>, vector<4x32xf32>
    %c0_1 = arith.constant 0 : index
    %c0_2 = arith.constant 0 : index
    %c0_3 = arith.constant 0 : index
    %1 = vector.load %arg4[%c0_1, %c0_2, %c0_3] : memref<1x32x256xf32, #tpu.memory_space<vmem>>, vector<1x32x256xf32>
    %2 = vector.shape_cast %1 : vector<1x32x256xf32> to vector<32x256xf32>
    %cst = arith.constant dense<0.000000e+00> : vector<4x256xf32>
    %3 = tpu.matmul %0, %2, %cst {dimension_numbers = #tpu.dot_dimension_numbers<[1], [0], [0], [1], [0, 0, 1, 1], [], []>} : vector<4x32xf32>, vector<32x256xf32>, vector<4x256xf32> -> vector<4x256xf32>
    %c0_4 = arith.constant 0 : index
    %c0_5 = arith.constant 0 : index
    %4 = vector.load %arg3[%c0_4, %c0_5] : memref<4x1xf32, #tpu.memory_space<vmem>>, vector<4x1xf32>
    %5 = vector.broadcast %4 : vector<4x1xf32> to vector<4x256xf32>
    %6 = arith.addf %3, %5 : vector<4x256xf32>
    %c0_6 = arith.constant 0 : index
    %c0_7 = arith.constant 0 : index
    %c0_8 = arith.constant 0 : index
    %7 = vector.load %arg5[%c0_6, %c0_7, %c0_8] : memref<1x4x256xf32, #tpu.memory_space<vmem>>, vector<1x4x256xf32>
    %8 = vector.shape_cast %7 : vector<1x4x256xf32> to vector<4x256xf32>
    %9 = vector.shape_cast %6 : vector<4x256xf32> to vector<1x4x256xf32>
    tpu.vector_store %arg5[%c0_6, %c0_7, %c0_8], %9 {strides = array<i32>} : memref<1x4x256xf32, #tpu.memory_space<vmem>>, vector<1x4x256xf32>,
    return
  }
  func.func @transform_0(%arg0: i32, %arg1: i32) -> (i32, i32) {
    %c0_i32 = arith.constant 0 : i32
    %c0_i32_0 = arith.constant 0 : i32
    %c0_i32_1 = arith.constant 0 : i32
    return %c0_i32, %c0_i32_0 : i32, i32
  }
  func.func @transform_1(%arg0: i32, %arg1: i32) -> (i32, i32) {
    %c0_i32 = arith.constant 0 : i32
    %c0_i32_0 = arith.constant 0 : i32
    %c0_i32_1 = arith.constant 0 : i32
    return %c0_i32, %c0_i32_0 : i32, i32
  }
  func.func @transform_2(%arg0: i32, %arg1: i32) -> (i32, i32, i32) {
    %c0_i32 = arith.constant 0 : i32
    %c0_i32_0 = arith.constant 0 : i32
    return %arg0, %c0_i32, %arg1 : i32, i32, i32
  }
  func.func @transform_3(%arg0: i32, %arg1: i32) -> (i32, i32, i32) {
    %c0_i32 = arith.constant 0 : i32
    %c0_i32_0 = arith.constant 0 : i32
    return %arg0, %c0_i32, %arg1 : i32, i32, i32
  }
}

</mosaic_0001>

<bundles_post_ra>
// kernel: down_forward.1
= control target key start
LH: loop header
LB: loop body
LE: loop exit
PB: predicated region body
PF: predicated region fallthrough
CT: control target
= control target key end

     0   :  { %s487_s12 = smov 0   ;;  %s489_s13 = smov 0   ;;  %s530_s0 = inlined_call_operand.vmem [shape: f32[4,32], index: 0, kind: input, shape index: {}]   ;;  %s531_s1 = inlined_call_operand.vmem [shape: f32[4,1], index: 1, kind: input, shape index: {}]   ;;  %s532_s2 = inlined_call_operand.vmem [shape: f32[2,32,256], index: 2, kind: input, shape index: {}]   ;;  %s533_s3 = inlined_call_operand.vmem [shape: f32[2,4,256], index: 3, kind: output, shape index: {}]  }
   0x1   :  { %s491_s14 = smov 0  }
   0x2 LB: > { %s25_s15 = sadd.s32 1, %s459_s13  ;;  %p396_p0 = scmp.ge.s32.totalorder %s463_s14, 1  ;;  %s463_s14 = sphi %s491_s14, %s13_s14   ;;  %s459_s13 = sphi %s489_s13, %s535_s13   ;;  %s455_s12 = sphi %s487_s12, %s534_s12  }
   0x3   : > { %p27_p1 = scmp.ge.s32.totalorder %s25_s15, 2  ;;  %p158_p2 = scmp.lt.s32.totalorder %s463_s14, 3 }
   0x5   : > { %s537_s15 = smov (%p27_p1, %s25_s15), 0  ;;  %p159_p3 = pnand %p396_p0, %p158_p2 }
   0x6   : > { %p191_p4 = scmp.lt.s32.totalorder (!%p159_p3), %s455_s12, 1  ;;  %v465_v0 = vmov (!%p159_p3), 0.0   ;;  %v466_v1 = vmov (!%p159_p3), 0   ;;  %v219_v2 = vld [vmem:[%s531_s1] sm:$0xf] (!%p159_p3)  ;;  %vm225_vm0 = vcmask (!%p159_p3), 261120  }
   0x7   : > { %162 = sbr.rel (%p159_p3) target bundleno = 246 (0xf6), region = 32  ;;  %293 = vmatprep.mubr.f32.mxu0 (!%p159_p3), %v465_v0  ;;  %440 = vset.pattern.permute.xlu0 (!%p159_p3), %v466_v1  ;;  %v210_v15 = vld [vmem:[%s530_s0] sm:$0xf] (!%p159_p3) }
   0x8   : > { %222 = vperm.xlu0 (!%p159_p3), %440, %v219_v2  }
   0xe   : > { %s539_s12 = smov (!%p191_p4, %s455_s12), 1 }
   0xf   : > { %s404_s18 = sshll.u32 %s539_s12, 6  ;;  %s405_s24 = sshll.u32 %s539_s12, 3 }
  0x10   : > { %s198_s21 = scalar_lea.vmem %s532_s2, %s404_s18  ;;  %s208_s27 = scalar_lea.vmem %s533_s3, %s405_s24 }
  0x11   : > { %v212_v3 = vld [vmem:[%s198_s21 + $0x8] sm:$0xff]  ;;  %v214_v4 = vld [vmem:[%s198_s21 + $0x18] sm:$0xff]  ;;  %v211_v5 = vld [vmem:[%s198_s21] sm:$0xff] }
  0x12   : > { %v406_v6 = vpack.c.bf16 %v214_v4, %v212_v3  ;;  %v213_v7 = vld [vmem:[%s198_s21 + $0x10] sm:$0xff]  ;;  %v216_v8 = vld [vmem:[%s198_s21 + $0x28] sm:$0xff]  ;;  %v218_v9 = vld [vmem:[%s198_s21 + $0x38] sm:$0xff] }
  0x13   : > { %v408_v10 = vpack.c.bf16 %v213_v7, %v211_v5  ;;  %v410_v11 = vpack.c.bf16 %v218_v9, %v216_v8  ;;  %v215_v12 = vld [vmem:[%s198_s21 + $0x20] sm:$0xff]  ;;  %v217_v13 = vld [vmem:[%s198_s21 + $0x30] sm:$0xff] }
  0x14   : > { %407 = vmatprep.subr.bf16.mxu0 %v406_v6  ;;  %v412_v14 = vpack.c.bf16 %v217_v13, %v215_v12 }
  0x15   : > { %409 = vmatpush1.bf16.msra.mxu0 %v408_v10 }
  0x16   : > { %411 = vmatprep.subr.bf16.mxu0 %v410_v11 }
  0x19   : > { %413 = vmatpush1.bf16.msra.mxu0 %v412_v14 }
  0x1c   : > { %401 = vmatmul.mubr.msk.f32.vlgmr.msra.gmra.mrb[0].mxu0 %vm225_vm0, %v210_v15 }
  0x87   : > { %v223_v16 = vpop.permute.xlu0 %222 }
  0xef   : > { %v295_v17 = vpop.f32.mrb[0].mxu0 }
  0xf0   : > { %v296_v18 = vadd.f32 %v295_v17, %v223_v16  ;;  %v297_v19 = vpop.f32.mrb[1].mxu0 }
  0xf1   : > { %v298_v20 = vadd.f32 %v297_v19, %v223_v16 }
  0xf3   : > { %v302_v21 = vcombine.low %v296_v18, %v298_v20 }
  0xf5   : > { %304 = vst [vmem:[%s208_s27] sm:$0xff] %v302_v21 }
  0xf6 PF: > { %s13_s14 = sadd.s32 1, %s463_s14   ;;  %s534_s12 = smov %s459_s13 }
  0xf7   : > { %p10_p5 = scmp.ge.s32.totalorder %s13_s14, 4   ;;  %s535_s13 = smov %s537_s15 }
  0xf9   :  { %12 = sbr.rel (!%p10_p5) target bundleno = 2 (0x2), region = 62 }

</bundles_post_ra>
